<compile_context>
chip_gen: v6e
topology: v6e:2x2x1
jax: 0.10.0
libtpu: 0.0.40
codegen_flags: <defaults>
</compile_context>

<pallas_src>
import jax
import jax.numpy as jnp
from jax import lax
from jax.experimental import pallas as pl
from jax.experimental.pallas import tpu as pltpu

VOCAB = 64      # input_size
HIDDEN = 32     # hidden_size
LANES = 4 * HIDDEN   # 128 — one lane-dense vreg row


# ----------------------------------------------------------------------------
# Kernel: full-sequence GRU encoder, single invocation, in-kernel time loop
# ----------------------------------------------------------------------------
def encoder_gru_seq_kernel(toks_ref,    # SMEM (T,) int32              (scalar prefetch)
                           table_ref,   # VMEM (VOCAB, 128) f32        token -> input-gate rows
                                        #   cols = [i_r+b_ir+b_hr | i_z+b_iz+b_hz | i_n+b_in | 0]
                           whh_ref,     # VMEM (H, 128) bf16           [W_hr^T | W_hz^T | W_hn^T | 0]
                           bhn_ref,     # VMEM (1, 128) f32            [0 | 0 | b_hn | 0]
                           h0_ref,      # VMEM (1, H) f32              initial hidden
                           out_ref):    # VMEM (T, 128) f32            per-step hidden (lane-padded)
    H = h0_ref.shape[1]
    T = out_ref.shape[0]
    V = table_ref.shape[0]

    # Hoisted loop-invariants (no per-step broadcast / reload).
    whh = whh_ref[...]                                   # (H, 128) bf16, resident
    bhn = bhn_ref[...]                                   # (1, 128) f32
    pad_zeros = jnp.zeros((1, 3 * H), jnp.float32)       # lane padding for the store

    def step(t, h):                                      # h: (1, H) f32 carry
        tok = jnp.clip(toks_ref[t], 0, V - 1)            # VMEM indexing is unchecked
        gi = table_ref[pl.ds(tok, 1), :]                 # (1, 128) f32  (input-side, precomputed)

        # Recurrent side: single bf16 MXU matmul, f32 accumulate.
        gh = jnp.dot(h.astype(jnp.bfloat16), whh,
                     preferred_element_type=jnp.float32) + bhn   # (1, 128)

        s = gi + gh                                      # r/z pre-activations in cols [0:2H)
        r = jax.nn.sigmoid(s[:, 0:H])
        z = jax.nn.sigmoid(s[:, H:2 * H])
        # PyTorch GRU n-gate: n = tanh(i_n + b_in + r * (h_n + b_hn))
        n = jnp.tanh(gi[:, 2 * H:3 * H] + r * gh[:, 2 * H:3 * H])
        h_new = (1.0 - z) * n + z * h

        # Lane-dense store: full 128-lane row (zero-padded), unmasked vst.
        out_ref[pl.ds(t, 1), :] = jnp.concatenate([h_new, pad_zeros], axis=1)
        return h_new

    unroll = True if T <= 16 else 8
    lax.fori_loop(0, T, step, h0_ref[...], unroll=unroll)


# ----------------------------------------------------------------------------
# Wrappers
# ----------------------------------------------------------------------------
def encode_sequence(tokens, hidden0, packed):
    """Run the encoder over a whole token sequence in one pallas_call.

    tokens : (T,) int32 token ids
    hidden0: (1, 1, H) float32 initial hidden state
    returns (outputs (T, 1, H), final_hidden (1, 1, H))
    """
    table, whh_pk, bhn = packed
    T = int(tokens.shape[0])
    V, L = table.shape
    H = L // 4
    h0 = hidden0.reshape(1, H).astype(jnp.float32)
    toks = tokens.astype(jnp.int32)

    outs = pl.pallas_call(
        encoder_gru_seq_kernel,
        out_shape=jax.ShapeDtypeStruct((T, L), jnp.float32),
        grid_spec=pltpu.PrefetchScalarGridSpec(
            num_scalar_prefetch=1,
            grid=(1,),                                        # single invocation; loop is in-kernel
            in_specs=[
                pl.BlockSpec((V, L), lambda i, toks: (0, 0)),  # token->input-gate table, resident
                pl.BlockSpec((H, L), lambda i, toks: (0, 0)),  # packed recurrent weights (bf16)
                pl.BlockSpec((1, L), lambda i, toks: (0, 0)),  # n-gate recurrent bias row
                pl.BlockSpec((1, H), lambda i, toks: (0, 0)),  # initial hidden
            ],
            out_specs=pl.BlockSpec((T, L), lambda i, toks: (0, 0)),  # lane-dense output block
        ),
        compiler_params=pltpu.CompilerParams(
            dimension_semantics=("arbitrary",),
        ),
    )(toks, table, whh_pk, bhn, h0)

    outputs = outs[:, :H].reshape(T, 1, H)                    # drop lane padding (layout plumbing)
    final_hidden = outputs[T - 1].reshape(1, 1, H)
    return outputs, final_hidden


def encoder_rnn_forward(token, hidden, packed):
    """Pallas equivalent of EncoderRNN.forward(input, hidden): one token step."""
    tokens = jnp.asarray(token, jnp.int32).reshape(1)
    outputs, h_new = encode_sequence(tokens, hidden, packed)
    return outputs.reshape(1, 1, -1), h_new


# ----------------------------------------------------------------------------
# Parameter construction (PyTorch layout) and packing for the kernel
# ----------------------------------------------------------------------------
def init_raw_params(key, vocab, hidden):
    """PyTorch-shaped params: emb (V,H), W_ih/W_hh (3H,H), b_ih/b_hh (3H,)."""
    k1, k2, k3, k4, k5 = jax.random.split(key, 5)
    scale = 1.0 / float(hidden) ** 0.5
    emb = jax.random.normal(k1, (vocab, hidden), jnp.float32)
    wih = jax.random.uniform(k2, (3 * hidden, hidden), jnp.float32, -scale, scale)
    whh = jax.random.uniform(k3, (3 * hidden, hidden), jnp.float32, -scale, scale)
    bih = jax.random.uniform(k4, (3 * hidden,), jnp.float32, -scale, scale)
    bhh = jax.random.uniform(k5, (3 * hidden,), jnp.float32, -scale, scale)
    return emb, wih, whh, bih, bhh


def pack_params(raw):
    """Precompute the token->input-gate table and pack the recurrent params.

    table  (V, 4H) f32 : emb[v] @ W_ih^T + b_ih, with b_hr/b_hz folded in; n-col keeps b_in;
                         last H columns are zero padding (lane-dense 128).
    whh_pk (H, 4H) bf16: [W_hr^T | W_hz^T | W_hn^T | 0]
    bhn    (1, 4H) f32 : [0 | 0 | b_hn | 0]   (b_hn is applied before the r-gating)
    """
    emb, wih, whh, bih, bhh = raw
    H = emb.shape[1]
    # Input-side projection done ONCE, at full precision, off the recurrence.
    gi = jnp.dot(emb, wih.T, precision=lax.Precision.HIGHEST) + bih      # (V, 3H) [r|z|n]
    gi = gi.at[:, :H].add(bhh[:H])                                       # fold constant b_hr
    gi = gi.at[:, H:2 * H].add(bhh[H:2 * H])                             # fold constant b_hz
    table = jnp.pad(gi, ((0, 0), (0, H))).astype(jnp.float32)            # (V, 4H)

    whh_pk = jnp.pad(whh.T, ((0, 0), (0, H))).astype(jnp.bfloat16)       # (H, 4H) bf16 MXU operand

    bhn = jnp.zeros((1, 4 * H), jnp.float32).at[0, 2 * H:3 * H].set(bhh[2 * H:])
    return table, whh_pk, bhn


# ----------------------------------------------------------------------------
# Pure-JAX reference (PyTorch GRU single-step semantics)
# ----------------------------------------------------------------------------
def _reference_step(tok, h, raw):
    emb, wih, whh, bih, bhh = raw
    H = h.shape[-1]
    x = emb[tok].reshape(1, H)
    h2 = h.reshape(1, H)
    gi = jnp.dot(x, wih.T, precision=lax.Precision.HIGHEST) + bih
    gh = jnp.dot(h2, whh.T, precision=lax.Precision.HIGHEST) + bhh
    i_r, i_z, i_n = gi[:, :H], gi[:, H:2 * H], gi[:, 2 * H:]
    h_r, h_z, h_n = gh[:, :H], gh[:, H:2 * H], gh[:, 2 * H:]
    r = jax.nn.sigmoid(i_r + h_r)
    z = jax.nn.sigmoid(i_z + h_z)
    n = jnp.tanh(i_n + r * h_n)
    return (1.0 - z) * n + z * h2                          # (1, H)


if __name__ == "__main__":
    key = jax.random.PRNGKey(0)
    raw = init_raw_params(key, VOCAB, HIDDEN)
    packed = pack_params(raw)

    T = 8
    tokens = jax.random.randint(jax.random.PRNGKey(1), (T,), 0, VOCAB, dtype=jnp.int32)
    hidden0 = jnp.zeros((1, 1, HIDDEN), jnp.float32)        # EncoderRNN.init_hidden()

    # Full-sequence encode (time loop inside a single kernel invocation).
    outputs, h_final = encode_sequence(tokens, hidden0, packed)
    outputs, h_final = jax.block_until_ready((outputs, h_final))

    # Reference: loop the single-step GRU in pure JAX (full precision).
    h = hidden0.reshape(1, HIDDEN)
    ref_rows = []
    for i in range(T):
        h = _reference_step(int(tokens[i]), h, raw)
        ref_rows.append(h)
    ref_outputs = jnp.stack(ref_rows, axis=0).reshape(T, 1, HIDDEN)

    # bf16 MXU operands on the recurrent dot -> tolerances loosened accordingly.
    assert outputs.shape == (T, 1, HIDDEN)
    assert h_final.shape == (1, 1, HIDDEN)
    assert jnp.allclose(outputs, ref_outputs, atol=2e-2, rtol=2e-2)
    assert jnp.allclose(h_final, ref_outputs[-1].reshape(1, 1, HIDDEN), atol=2e-2, rtol=2e-2)

    # Single-token forward, matching EncoderRNN.forward(input, hidden) exactly.
    out1, h1 = encoder_rnn_forward(tokens[0], hidden0, packed)
    out1, h1 = jax.block_until_ready((out1, h1))
    ref1 = _reference_step(int(tokens[0]), hidden0.reshape(1, HIDDEN), raw).reshape(1, 1, HIDDEN)
    assert out1.shape == (1, 1, HIDDEN) and h1.shape == (1, 1, HIDDEN)
    assert jnp.allclose(out1, ref1, atol=2e-2, rtol=2e-2)
    assert jnp.allclose(h1, ref1, atol=2e-2, rtol=2e-2)

    print("KERNEL_OK")
</pallas_src>

<mosaic_0001>
module attributes {stable_mosaic.version = 11 : i64} {
  func.func @encoder_gru_seq_kernel(%arg0: i32, %arg1: memref<8xi32, #tpu.memory_space<smem>>, %arg2: memref<64x128xf32, #tpu.memory_space<vmem>>, %arg3: memref<32x128xbf16, #tpu.memory_space<vmem>>, %arg4: memref<1x128xf32, #tpu.memory_space<vmem>>, %arg5: memref<1x32xf32, #tpu.memory_space<vmem>>, %arg6: memref<8x128xf32, #tpu.memory_space<vmem>>) attributes {dimension_semantics = [#tpu.dimension_semantics<arbitrary>], iteration_bounds = array<i64: 1>, scalar_prefetch = 1 : i64, scratch_operands = 0 : i64, tpu.core_type = #tpu.core_type<tc>, window_params = [{pipeline_mode = #tpu.pipeline_mode<synchronous>, transform_indices = @transform_0, window_bounds = array<i64: 64, 128>}, {pipeline_mode = #tpu.pipeline_mode<synchronous>, transform_indices = @transform_1, window_bounds = array<i64: 32, 128>}, {pipeline_mode = #tpu.pipeline_mode<synchronous>, transform_indices = @transform_2, window_bounds = array<i64: 1, 128>}, {pipeline_mode = #tpu.pipeline_mode<synchronous>, transform_indices = @transform_3, window_bounds = array<i64: 1, 32>}, {pipeline_mode = #tpu.pipeline_mode<synchronous>, transform_indices = @transform_4, window_bounds = array<i64: 8, 128>}]} {
    %c0 = arith.constant 0 : index
    %c0_0 = arith.constant 0 : index
    %0 = vector.load %arg3[%c0, %c0_0] : memref<32x128xbf16, #tpu.memory_space<vmem>>, vector<32x128xbf16>
    %c0_1 = arith.constant 0 : index
    %c0_2 = arith.constant 0 : index
    %1 = vector.load %arg4[%c0_1, %c0_2] : memref<1x128xf32, #tpu.memory_space<vmem>>, vector<1x128xf32>
    %cst = arith.constant 0.000000e+00 : f32
    %2 = vector.broadcast %cst : f32 to vector<1x96xf32>
    %c0_3 = arith.constant 0 : index
    %c0_4 = arith.constant 0 : index
    %3 = vector.load %arg5[%c0_3, %c0_4] : memref<1x32xf32, #tpu.memory_space<vmem>>, vector<1x32xf32>
    %c0_i32 = arith.constant 0 : i32
    %4 = arith.index_cast %c0_i32 : i32 to index
    %5 = memref.load %arg1[%4] : memref<8xi32, #tpu.memory_space<smem>>
    %c0_i32_5 = arith.constant 0 : i32
    %c63_i32 = arith.constant 63 : i32
    %6 = arith.maxsi %c0_i32_5, %5 : i32
    %7 = arith.minsi %c63_i32, %6 : i32
    %8 = arith.index_cast %7 : i32 to index
    %c0_6 = arith.constant 0 : index
    %9 = vector.load %arg2[%8, %c0_6] : memref<64x128xf32, #tpu.memory_space<vmem>>, vector<1x128xf32>
    %10 = arith.truncf %3 : vector<1x32xf32> to vector<1x32xbf16>
    %cst_7 = arith.constant dense<0.000000e+00> : vector<1x128xf32>
    %11 = tpu.matmul %10, %0, %cst_7 {dimension_numbers = #tpu.dot_dimension_numbers<[1], [0], [0], [1], [0, 0, 1, 1], [], []>} : vector<1x32xbf16>, vector<32x128xbf16>, vector<1x128xf32> -> vector<1x128xf32>
    %12 = arith.addf %11, %1 : vector<1x128xf32>
    %13 = arith.addf %9, %12 : vector<1x128xf32>
    %14 = vector.extract_strided_slice %13 {offsets = [0, 0], sizes = [1, 32], strides = [1, 1]} : vector<1x128xf32> to vector<1x32xf32>
    %15 = arith.negf %14 : vector<1x32xf32>
    %16 = math.exp %15 : vector<1x32xf32>
    %cst_8 = arith.constant 1.000000e+00 : f32
    %17 = vector.broadcast %cst_8 : f32 to vector<1x32xf32>
    %18 = arith.addf %17, %16 : vector<1x32xf32>
    %19 = arith.divf %17, %18 : vector<1x32xf32>
    %20 = vector.extract_strided_slice %13 {offsets = [0, 32], sizes = [1, 32], strides = [1, 1]} : vector<1x128xf32> to vector<1x32xf32>
    %21 = arith.negf %20 : vector<1x32xf32>
    %22 = math.exp %21 : vector<1x32xf32>
    %cst_9 = arith.constant 1.000000e+00 : f32
    %23 = vector.broadcast %cst_9 : f32 to vector<1x32xf32>
    %24 = arith.addf %23, %22 : vector<1x32xf32>
    %25 = arith.divf %23, %24 : vector<1x32xf32>
    %26 = vector.extract_strided_slice %9 {offsets = [0, 64], sizes = [1, 32], strides = [1, 1]} : vector<1x128xf32> to vector<1x32xf32>
    %27 = vector.extract_strided_slice %12 {offsets = [0, 64], sizes = [1, 32], strides = [1, 1]} : vector<1x128xf32> to vector<1x32xf32>
    %28 = arith.mulf %19, %27 : vector<1x32xf32>
    %29 = arith.addf %26, %28 : vector<1x32xf32>
    %30 = math.tanh %29 : vector<1x32xf32>
    %cst_10 = arith.constant 1.000000e+00 : f32
    %31 = vector.broadcast %cst_10 : f32 to vector<1x32xf32>
    %32 = arith.subf %31, %25 : vector<1x32xf32>
    %33 = arith.mulf %32, %30 : vector<1x32xf32>
    %34 = arith.mulf %25, %3 : vector<1x32xf32>
    %35 = arith.addf %33, %34 : vector<1x32xf32>
    %36 = tpu.concatenate %35, %2 in 1 : vector<1x32xf32>, vector<1x96xf32> -> vector<1x128xf32>
    %37 = arith.index_cast %c0_i32 : i32 to index
    %c0_11 = arith.constant 0 : index
    %38 = vector.load %arg6[%37, %c0_11] : memref<8x128xf32, #tpu.memory_space<vmem>>, vector<1x128xf32>
    tpu.vector_store %arg6[%37, %c0_11], %36 {strides = array<i32>} : memref<8x128xf32, #tpu.memory_space<vmem>>, vector<1x128xf32>,
    %c1_i32 = arith.constant 1 : i32
    %39 = arith.index_cast %c1_i32 : i32 to index
    %40 = memref.load %arg1[%39] : memref<8xi32, #tpu.memory_space<smem>>
    %c0_i32_12 = arith.constant 0 : i32
    %c63_i32_13 = arith.constant 63 : i32
    %41 = arith.maxsi %c0_i32_12, %40 : i32
    %42 = arith.minsi %c63_i32_13, %41 : i32
    %43 = arith.index_cast %42 : i32 to index
    %c0_14 = arith.constant 0 : index
    %44 = vector.load %arg2[%43, %c0_14] : memref<64x128xf32, #tpu.memory_space<vmem>>, vector<1x128xf32>
    %45 = arith.truncf %35 : vector<1x32xf32> to vector<1x32xbf16>
    %cst_15 = arith.constant dense<0.000000e+00> : vector<1x128xf32>
    %46 = tpu.matmul %45, %0, %cst_15 {dimension_numbers = #tpu.dot_dimension_numbers<[1], [0], [0], [1], [0, 0, 1, 1], [], []>} : vector<1x32xbf16>, vector<32x128xbf16>, vector<1x128xf32> -> vector<1x128xf32>
    %47 = arith.addf %46, %1 : vector<1x128xf32>
    %48 = arith.addf %44, %47 : vector<1x128xf32>
    %49 = vector.extract_strided_slice %48 {offsets = [0, 0], sizes = [1, 32], strides = [1, 1]} : vector<1x128xf32> to vector<1x32xf32>
    %50 = arith.negf %49 : vector<1x32xf32>
    %51 = math.exp %50 : vector<1x32xf32>
    %cst_16 = arith.constant 1.000000e+00 : f32
    %52 = vector.broadcast %cst_16 : f32 to vector<1x32xf32>
    %53 = arith.addf %52, %51 : vector<1x32xf32>
    %54 = arith.divf %52, %53 : vector<1x32xf32>
    %55 = vector.extract_strided_slice %48 {offsets = [0, 32], sizes = [1, 32], strides = [1, 1]} : vector<1x128xf32> to vector<1x32xf32>
    %56 = arith.negf %55 : vector<1x32xf32>
    %57 = math.exp %56 : vector<1x32xf32>
    %cst_17 = arith.constant 1.000000e+00 : f32
    %58 = vector.broadcast %cst_17 : f32 to vector<1x32xf32>
    %59 = arith.addf %58, %57 : vector<1x32xf32>
    %60 = arith.divf %58, %59 : vector<1x32xf32>
    %61 = vector.extract_strided_slice %44 {offsets = [0, 64], sizes = [1, 32], strides = [1, 1]} : vector<1x128xf32> to vector<1x32xf32>
    %62 = vector.extract_strided_slice %47 {offsets = [0, 64], sizes = [1, 32], strides = [1, 1]} : vector<1x128xf32> to vector<1x32xf32>
    %63 = arith.mulf %54, %62 : vector<1x32xf32>
    %64 = arith.addf %61, %63 : vector<1x32xf32>
    %65 = math.tanh %64 : vector<1x32xf32>
    %cst_18 = arith.constant 1.000000e+00 : f32
    %66 = vector.broadcast %cst_18 : f32 to vector<1x32xf32>
    %67 = arith.subf %66, %60 : vector<1x32xf32>
    %68 = arith.mulf %67, %65 : vector<1x32xf32>
    %69 = arith.mulf %60, %35 : vector<1x32xf32>
    %70 = arith.addf %68, %69 : vector<1x32xf32>
    %71 = tpu.concatenate %70, %2 in 1 : vector<1x32xf32>, vector<1x96xf32> -> vector<1x128xf32>
    %72 = arith.index_cast %c1_i32 : i32 to index
    %c0_19 = arith.constant 0 : index
    %73 = vector.load %arg6[%72, %c0_19] : memref<8x128xf32, #tpu.memory_space<vmem>>, vector<1x128xf32>
    tpu.vector_store %arg6[%72, %c0_19], %71 {strides = array<i32>} : memref<8x128xf32, #tpu.memory_space<vmem>>, vector<1x128xf32>,
    %c2_i32 = arith.constant 2 : i32
    %74 = arith.index_cast %c2_i32 : i32 to index
    %75 = memref.load %arg1[%74] : memref<8xi32, #tpu.memory_space<smem>>
    %c0_i32_20 = arith.constant 0 : i32
    %c63_i32_21 = arith.constant 63 : i32
    %76 = arith.maxsi %c0_i32_20, %75 : i32
    %77 = arith.minsi %c63_i32_21, %76 : i32
    %78 = arith.index_cast %77 : i32 to index
    %c0_22 = arith.constant 0 : index
    %79 = vector.load %arg2[%78, %c0_22] : memref<64x128xf32, #tpu.memory_space<vmem>>, vector<1x128xf32>
    %80 = arith.truncf %70 : vector<1x32xf32> to vector<1x32xbf16>
    %cst_23 = arith.constant dense<0.000000e+00> : vector<1x128xf32>
    %81 = tpu.matmul %80, %0, %cst_23 {dimension_numbers = #tpu.dot_dimension_numbers<[1], [0], [0], [1], [0, 0, 1, 1], [], []>} : vector<1x32xbf16>, vector<32x128xbf16>, vector<1x128xf32> -> vector<1x128xf32>
    %82 = arith.addf %81, %1 : vector<1x128xf32>
    %83 = arith.addf %79, %82 : vector<1x128xf32>
    %84 = vector.extract_strided_slice %83 {offsets = [0, 0], sizes = [1, 32], strides = [1, 1]} : vector<1x128xf32> to vector<1x32xf32>
    %85 = arith.negf %84 : vector<1x32xf32>
    %86 = math.exp %85 : vector<1x32xf32>
    %cst_24 = arith.constant 1.000000e+00 : f32
    %87 = vector.broadcast %cst_24 : f32 to vector<1x32xf32>
    %88 = arith.addf %87, %86 : vector<1x32xf32>
    %89 = arith.divf %87, %88 : vector<1x32xf32>
    %90 = vector.extract_strided_slice %83 {offsets = [0, 32], sizes = [1, 32], strides = [1, 1]} : vector<1x128xf32> to vector<1x32xf32>
    %91 = arith.negf %90 : vector<1x32xf32>
    %92 = math.exp %91 : vector<1x32xf32>
    %cst_25 = arith.constant 1.000000e+00 : f32
    %93 = vector.broadcast %cst_25 : f32 to vector<1x32xf32>
    %94 = arith.addf %93, %92 : vector<1x32xf32>
    %95 = arith.divf %93, %94 : vector<1x32xf32>
    %96 = vector.extract_strided_slice %79 {offsets = [0, 64], sizes = [1, 32], strides = [1, 1]} : vector<1x128xf32> to vector<1x32xf32>
    %97 = vector.extract_strided_slice %82 {offsets = [0, 64], sizes = [1, 32], strides = [1, 1]} : vector<1x128xf32> to vector<1x32xf32>
    %98 = arith.mulf %89, %97 : vector<1x32xf32>
    %99 = arith.addf %96, %98 : vector<1x32xf32>
    %100 = math.tanh %99 : vector<1x32xf32>
    %cst_26 = arith.constant 1.000000e+00 : f32
    %101 = vector.broadcast %cst_26 : f32 to vector<1x32xf32>
    %102 = arith.subf %101, %95 : vector<1x32xf32>
    %103 = arith.mulf %102, %100 : vector<1x32xf32>
    %104 = arith.mulf %95, %70 : vector<1x32xf32>
    %105 = arith.addf %103, %104 : vector<1x32xf32>
    %106 = tpu.concatenate %105, %2 in 1 : vector<1x32xf32>, vector<1x96xf32> -> vector<1x128xf32>
    %107 = arith.index_cast %c2_i32 : i32 to index
    %c0_27 = arith.constant 0 : index
    %108 = vector.load %arg6[%107, %c0_27] : memref<8x128xf32, #tpu.memory_space<vmem>>, vector<1x128xf32>
    tpu.vector_store %arg6[%107, %c0_27], %106 {strides = array<i32>} : memref<8x128xf32, #tpu.memory_space<vmem>>, vector<1x128xf32>,
    %c3_i32 = arith.constant 3 : i32
    %109 = arith.index_cast %c3_i32 : i32 to index
    %110 = memref.load %arg1[%109] : memref<8xi32, #tpu.memory_space<smem>>
    %c0_i32_28 = arith.constant 0 : i32
    %c63_i32_29 = arith.constant 63 : i32
    %111 = arith.maxsi %c0_i32_28, %110 : i32
    %112 = arith.minsi %c63_i32_29, %111 : i32
    %113 = arith.index_cast %112 : i32 to index
    %c0_30 = arith.constant 0 : index
    %114 = vector.load %arg2[%113, %c0_30] : memref<64x128xf32, #tpu.memory_space<vmem>>, vector<1x128xf32>
    %115 = arith.truncf %105 : vector<1x32xf32> to vector<1x32xbf16>
    %cst_31 = arith.constant dense<0.000000e+00> : vector<1x128xf32>
    %116 = tpu.matmul %115, %0, %cst_31 {dimension_numbers = #tpu.dot_dimension_numbers<[1], [0], [0], [1], [0, 0, 1, 1], [], []>} : vector<1x32xbf16>, vector<32x128xbf16>, vector<1x128xf32> -> vector<1x128xf32>
    %117 = arith.addf %116, %1 : vector<1x128xf32>
    %118 = arith.addf %114, %117 : vector<1x128xf32>
    %119 = vector.extract_strided_slice %118 {offsets = [0, 0], sizes = [1, 32], strides = [1, 1]} : vector<1x128xf32> to vector<1x32xf32>
    %120 = arith.negf %119 : vector<1x32xf32>
    %121 = math.exp %120 : vector<1x32xf32>
    %cst_32 = arith.constant 1.000000e+00 : f32
    %122 = vector.broadcast %cst_32 : f32 to vector<1x32xf32>
    %123 = arith.addf %122, %121 : vector<1x32xf32>
    %124 = arith.divf %122, %123 : vector<1x32xf32>
    %125 = vector.extract_strided_slice %118 {offsets = [0, 32], sizes = [1, 32], strides = [1, 1]} : vector<1x128xf32> to vector<1x32xf32>
    %126 = arith.negf %125 : vector<1x32xf32>
    %127 = math.exp %126 : vector<1x32xf32>
    %cst_33 = arith.constant 1.000000e+00 : f32
    %128 = vector.broadcast %cst_33 : f32 to vector<1x32xf32>
    %129 = arith.addf %128, %127 : vector<1x32xf32>
    %130 = arith.divf %128, %129 : vector<1x32xf32>
    %131 = vector.extract_strided_slice %114 {offsets = [0, 64], sizes = [1, 32], strides = [1, 1]} : vector<1x128xf32> to vector<1x32xf32>
    %132 = vector.extract_strided_slice %117 {offsets = [0, 64], sizes = [1, 32], strides = [1, 1]} : vector<1x128xf32> to vector<1x32xf32>
    %133 = arith.mulf %124, %132 : vector<1x32xf32>
    %134 = arith.addf %131, %133 : vector<1x32xf32>
    %135 = math.tanh %134 : vector<1x32xf32>
    %cst_34 = arith.constant 1.000000e+00 : f32
    %136 = vector.broadcast %cst_34 : f32 to vector<1x32xf32>
    %137 = arith.subf %136, %130 : vector<1x32xf32>
    %138 = arith.mulf %137, %135 : vector<1x32xf32>
    %139 = arith.mulf %130, %105 : vector<1x32xf32>
    %140 = arith.addf %138, %139 : vector<1x32xf32>
    %141 = tpu.concatenate %140, %2 in 1 : vector<1x32xf32>, vector<1x96xf32> -> vector<1x128xf32>
    %142 = arith.index_cast %c3_i32 : i32 to index
    %c0_35 = arith.constant 0 : index
    %143 = vector.load %arg6[%142, %c0_35] : memref<8x128xf32, #tpu.memory_space<vmem>>, vector<1x128xf32>
    tpu.vector_store %arg6[%142, %c0_35], %141 {strides = array<i32>} : memref<8x128xf32, #tpu.memory_space<vmem>>, vector<1x128xf32>,
    %c4_i32 = arith.constant 4 : i32
    %144 = arith.index_cast %c4_i32 : i32 to index
    %145 = memref.load %arg1[%144] : memref<8xi32, #tpu.memory_space<smem>>
    %c0_i32_36 = arith.constant 0 : i32
    %c63_i32_37 = arith.constant 63 : i32
    %146 = arith.maxsi %c0_i32_36, %145 : i32
    %147 = arith.minsi %c63_i32_37, %146 : i32
    %148 = arith.index_cast %147 : i32 to index
    %c0_38 = arith.constant 0 : index
    %149 = vector.load %arg2[%148, %c0_38] : memref<64x128xf32, #tpu.memory_space<vmem>>, vector<1x128xf32>
    %150 = arith.truncf %140 : vector<1x32xf32> to vector<1x32xbf16>
    %cst_39 = arith.constant dense<0.000000e+00> : vector<1x128xf32>
    %151 = tpu.matmul %150, %0, %cst_39 {dimension_numbers = #tpu.dot_dimension_numbers<[1], [0], [0], [1], [0, 0, 1, 1], [], []>} : vector<1x32xbf16>, vector<32x128xbf16>, vector<1x128xf32> -> vector<1x128xf32>
    %152 = arith.addf %151, %1 : vector<1x128xf32>
    %153 = arith.addf %149, %152 : vector<1x128xf32>
    %154 = vector.extract_strided_slice %153 {offsets = [0, 0], sizes = [1, 32], strides = [1, 1]} : vector<1x128xf32> to vector<1x32xf32>
    %155 = arith.negf %154 : vector<1x32xf32>
    %156 = math.exp %155 : vector<1x32xf32>
    %cst_40 = arith.constant 1.000000e+00 : f32
    %157 = vector.broadcast %cst_40 : f32 to vector<1x32xf32>
    %158 = arith.addf %157, %156 : vector<1x32xf32>
    %159 = arith.divf %157, %158 : vector<1x32xf32>
    %160 = vector.extract_strided_slice %153 {offsets = [0, 32], sizes = [1, 32], strides = [1, 1]} : vector<1x128xf32> to vector<1x32xf32>
    %161 = arith.negf %160 : vector<1x32xf32>
    %162 = math.exp %161 : vector<1x32xf32>
    %cst_41 = arith.constant 1.000000e+00 : f32
    %163 = vector.broadcast %cst_41 : f32 to vector<1x32xf32>
    %164 = arith.addf %163, %162 : vector<1x32xf32>
    %165 = arith.divf %163, %164 : vector<1x32xf32>
    %166 = vector.extract_strided_slice %149 {offsets = [0, 64], sizes = [1, 32], strides = [1, 1]} : vector<1x128xf32> to vector<1x32xf32>
    %167 = vector.extract_strided_slice %152 {offsets = [0, 64], sizes = [1, 32], strides = [1, 1]} : vector<1x128xf32> to vector<1x32xf32>
    %168 = arith.mulf %159, %167 : vector<1x32xf32>
    %169 = arith.addf %166, %168 : vector<1x32xf32>
    %170 = math.tanh %169 : vector<1x32xf32>
    %cst_42 = arith.constant 1.000000e+00 : f32
    %171 = vector.broadcast %cst_42 : f32 to vector<1x32xf32>
    %172 = arith.subf %171, %165 : vector<1x32xf32>
    %173 = arith.mulf %172, %170 : vector<1x32xf32>
    %174 = arith.mulf %165, %140 : vector<1x32xf32>
    %175 = arith.addf %173, %174 : vector<1x32xf32>
    %176 = tpu.concatenate %175, %2 in 1 : vector<1x32xf32>, vector<1x96xf32> -> vector<1x128xf32>
    %177 = arith.index_cast %c4_i32 : i32 to index
    %c0_43 = arith.constant 0 : index
    %178 = vector.load %arg6[%177, %c0_43] : memref<8x128xf32, #tpu.memory_space<vmem>>, vector<1x128xf32>
    tpu.vector_store %arg6[%177, %c0_43], %176 {strides = array<i32>} : memref<8x128xf32, #tpu.memory_space<vmem>>, vector<1x128xf32>,
    %c5_i32 = arith.constant 5 : i32
    %179 = arith.index_cast %c5_i32 : i32 to index
    %180 = memref.load %arg1[%179] : memref<8xi32, #tpu.memory_space<smem>>
    %c0_i32_44 = arith.constant 0 : i32
    %c63_i32_45 = arith.constant 63 : i32
    %181 = arith.maxsi %c0_i32_44, %180 : i32
    %182 = arith.minsi %c63_i32_45, %181 : i32
    %183 = arith.index_cast %182 : i32 to index
    %c0_46 = arith.constant 0 : index
    %184 = vector.load %arg2[%183, %c0_46] : memref<64x128xf32, #tpu.memory_space<vmem>>, vector<1x128xf32>
    %185 = arith.truncf %175 : vector<1x32xf32> to vector<1x32xbf16>
    %cst_47 = arith.constant dense<0.000000e+00> : vector<1x128xf32>
    %186 = tpu.matmul %185, %0, %cst_47 {dimension_numbers = #tpu.dot_dimension_numbers<[1], [0], [0], [1], [0, 0, 1, 1], [], []>} : vector<1x32xbf16>, vector<32x128xbf16>, vector<1x128xf32> -> vector<1x128xf32>
    %187 = arith.addf %186, %1 : vector<1x128xf32>
    %188 = arith.addf %184, %187 : vector<1x128xf32>
    %189 = vector.extract_strided_slice %188 {offsets = [0, 0], sizes = [1, 32], strides = [1, 1]} : vector<1x128xf32> to vector<1x32xf32>
    %190 = arith.negf %189 : vector<1x32xf32>
    %191 = math.exp %190 : vector<1x32xf32>
    %cst_48 = arith.constant 1.000000e+00 : f32
    %192 = vector.broadcast %cst_48 : f32 to vector<1x32xf32>
    %193 = arith.addf %192, %191 : vector<1x32xf32>
    %194 = arith.divf %192, %193 : vector<1x32xf32>
    %195 = vector.extract_strided_slice %188 {offsets = [0, 32], sizes = [1, 32], strides = [1, 1]} : vector<1x128xf32> to vector<1x32xf32>
    %196 = arith.negf %195 : vector<1x32xf32>
    %197 = math.exp %196 : vector<1x32xf32>
    %cst_49 = arith.constant 1.000000e+00 : f32
    %198 = vector.broadcast %cst_49 : f32 to vector<1x32xf32>
    %199 = arith.addf %198, %197 : vector<1x32xf32>
    %200 = arith.divf %198, %199 : vector<1x32xf32>
    %201 = vector.extract_strided_slice %184 {offsets = [0, 64], sizes = [1, 32], strides = [1, 1]} : vector<1x128xf32> to vector<1x32xf32>
    %202 = vector.extract_strided_slice %187 {offsets = [0, 64], sizes = [1, 32], strides = [1, 1]} : vector<1x128xf32> to vector<1x32xf32>
    %203 = arith.mulf %194, %202 : vector<1x32xf32>
    %204 = arith.addf %201, %203 : vector<1x32xf32>
    %205 = math.tanh %204 : vector<1x32xf32>
    %cst_50 = arith.constant 1.000000e+00 : f32
    %206 = vector.broadcast %cst_50 : f32 to vector<1x32xf32>
    %207 = arith.subf %206, %200 : vector<1x32xf32>
    %208 = arith.mulf %207, %205 : vector<1x32xf32>
    %209 = arith.mulf %200, %175 : vector<1x32xf32>
    %210 = arith.addf %208, %209 : vector<1x32xf32>
    %211 = tpu.concatenate %210, %2 in 1 : vector<1x32xf32>, vector<1x96xf32> -> vector<1x128xf32>
    %212 = arith.index_cast %c5_i32 : i32 to index
    %c0_51 = arith.constant 0 : index
    %213 = vector.load %arg6[%212, %c0_51] : memref<8x128xf32, #tpu.memory_space<vmem>>, vector<1x128xf32>
    tpu.vector_store %arg6[%212, %c0_51], %211 {strides = array<i32>} : memref<8x128xf32, #tpu.memory_space<vmem>>, vector<1x128xf32>,
    %c6_i32 = arith.constant 6 : i32
    %214 = arith.index_cast %c6_i32 : i32 to index
    %215 = memref.load %arg1[%214] : memref<8xi32, #tpu.memory_space<smem>>
    %c0_i32_52 = arith.constant 0 : i32
    %c63_i32_53 = arith.constant 63 : i32
    %216 = arith.maxsi %c0_i32_52, %215 : i32
    %217 = arith.minsi %c63_i32_53, %216 : i32
    %218 = arith.index_cast %217 : i32 to index
    %c0_54 = arith.constant 0 : index
    %219 = vector.load %arg2[%218, %c0_54] : memref<64x128xf32, #tpu.memory_space<vmem>>, vector<1x128xf32>
    %220 = arith.truncf %210 : vector<1x32xf32> to vector<1x32xbf16>
    %cst_55 = arith.constant dense<0.000000e+00> : vector<1x128xf32>
    %221 = tpu.matmul %220, %0, %cst_55 {dimension_numbers = #tpu.dot_dimension_numbers<[1], [0], [0], [1], [0, 0, 1, 1], [], []>} : vector<1x32xbf16>, vector<32x128xbf16>, vector<1x128xf32> -> vector<1x128xf32>
    %222 = arith.addf %221, %1 : vector<1x128xf32>
    %223 = arith.addf %219, %222 : vector<1x128xf32>
    %224 = vector.extract_strided_slice %223 {offsets = [0, 0], sizes = [1, 32], strides = [1, 1]} : vector<1x128xf32> to vector<1x32xf32>
    %225 = arith.negf %224 : vector<1x32xf32>
    %226 = math.exp %225 : vector<1x32xf32>
    %cst_56 = arith.constant 1.000000e+00 : f32
    %227 = vector.broadcast %cst_56 : f32 to vector<1x32xf32>
    %228 = arith.addf %227, %226 : vector<1x32xf32>
    %229 = arith.divf %227, %228 : vector<1x32xf32>
    %230 = vector.extract_strided_slice %223 {offsets = [0, 32], sizes = [1, 32], strides = [1, 1]} : vector<1x128xf32> to vector<1x32xf32>
    %231 = arith.negf %230 : vector<1x32xf32>
    %232 = math.exp %231 : vector<1x32xf32>
    %cst_57 = arith.constant 1.000000e+00 : f32
    %233 = vector.broadcast %cst_57 : f32 to vector<1x32xf32>
    %234 = arith.addf %233, %232 : vector<1x32xf32>
    %235 = arith.divf %233, %234 : vector<1x32xf32>
    %236 = vector.extract_strided_slice %219 {offsets = [0, 64], sizes = [1, 32], strides = [1, 1]} : vector<1x128xf32> to vector<1x32xf32>
    %237 = vector.extract_strided_slice %222 {offsets = [0, 64], sizes = [1, 32], strides = [1, 1]} : vector<1x128xf32> to vector<1x32xf32>
    %238 = arith.mulf %229, %237 : vector<1x32xf32>
    %239 = arith.addf %236, %238 : vector<1x32xf32>
    %240 = math.tanh %239 : vector<1x32xf32>
    %cst_58 = arith.constant 1.000000e+00 : f32
    %241 = vector.broadcast %cst_58 : f32 to vector<1x32xf32>
    %242 = arith.subf %241, %235 : vector<1x32xf32>
    %243 = arith.mulf %242, %240 : vector<1x32xf32>
    %244 = arith.mulf %235, %210 : vector<1x32xf32>
    %245 = arith.addf %243, %244 : vector<1x32xf32>
    %246 = tpu.concatenate %245, %2 in 1 : vector<1x32xf32>, vector<1x96xf32> -> vector<1x128xf32>
    %247 = arith.index_cast %c6_i32 : i32 to index
    %c0_59 = arith.constant 0 : index
    %248 = vector.load %arg6[%247, %c0_59] : memref<8x128xf32, #tpu.memory_space<vmem>>, vector<1x128xf32>
    tpu.vector_store %arg6[%247, %c0_59], %246 {strides = array<i32>} : memref<8x128xf32, #tpu.memory_space<vmem>>, vector<1x128xf32>,
    %c7_i32 = arith.constant 7 : i32
    %249 = arith.index_cast %c7_i32 : i32 to index
    %250 = memref.load %arg1[%249] : memref<8xi32, #tpu.memory_space<smem>>
    %c0_i32_60 = arith.constant 0 : i32
    %c63_i32_61 = arith.constant 63 : i32
    %251 = arith.maxsi %c0_i32_60, %250 : i32
    %252 = arith.minsi %c63_i32_61, %251 : i32
    %253 = arith.index_cast %252 : i32 to index
    %c0_62 = arith.constant 0 : index
    %254 = vector.load %arg2[%253, %c0_62] : memref<64x128xf32, #tpu.memory_space<vmem>>, vector<1x128xf32>
    %255 = arith.truncf %245 : vector<1x32xf32> to vector<1x32xbf16>
    %cst_63 = arith.constant dense<0.000000e+00> : vector<1x128xf32>
    %256 = tpu.matmul %255, %0, %cst_63 {dimension_numbers = #tpu.dot_dimension_numbers<[1], [0], [0], [1], [0, 0, 1, 1], [], []>} : vector<1x32xbf16>, vector<32x128xbf16>, vector<1x128xf32> -> vector<1x128xf32>
    %257 = arith.addf %256, %1 : vector<1x128xf32>
    %258 = arith.addf %254, %257 : vector<1x128xf32>
    %259 = vector.extract_strided_slice %258 {offsets = [0, 0], sizes = [1, 32], strides = [1, 1]} : vector<1x128xf32> to vector<1x32xf32>
    %260 = arith.negf %259 : vector<1x32xf32>
    %261 = math.exp %260 : vector<1x32xf32>
    %cst_64 = arith.constant 1.000000e+00 : f32
    %262 = vector.broadcast %cst_64 : f32 to vector<1x32xf32>
    %263 = arith.addf %262, %261 : vector<1x32xf32>
    %264 = arith.divf %262, %263 : vector<1x32xf32>
    %265 = vector.extract_strided_slice %258 {offsets = [0, 32], sizes = [1, 32], strides = [1, 1]} : vector<1x128xf32> to vector<1x32xf32>
    %266 = arith.negf %265 : vector<1x32xf32>
    %267 = math.exp %266 : vector<1x32xf32>
    %cst_65 = arith.constant 1.000000e+00 : f32
    %268 = vector.broadcast %cst_65 : f32 to vector<1x32xf32>
    %269 = arith.addf %268, %267 : vector<1x32xf32>
    %270 = arith.divf %268, %269 : vector<1x32xf32>
    %271 = vector.extract_strided_slice %254 {offsets = [0, 64], sizes = [1, 32], strides = [1, 1]} : vector<1x128xf32> to vector<1x32xf32>
    %272 = vector.extract_strided_slice %257 {offsets = [0, 64], sizes = [1, 32], strides = [1, 1]} : vector<1x128xf32> to vector<1x32xf32>
    %273 = arith.mulf %264, %272 : vector<1x32xf32>
    %274 = arith.addf %271, %273 : vector<1x32xf32>
    %275 = math.tanh %274 : vector<1x32xf32>
    %cst_66 = arith.constant 1.000000e+00 : f32
    %276 = vector.broadcast %cst_66 : f32 to vector<1x32xf32>
    %277 = arith.subf %276, %270 : vector<1x32xf32>
    %278 = arith.mulf %277, %275 : vector<1x32xf32>
    %279 = arith.mulf %270, %245 : vector<1x32xf32>
    %280 = arith.addf %278, %279 : vector<1x32xf32>
    %281 = tpu.concatenate %280, %2 in 1 : vector<1x32xf32>, vector<1x96xf32> -> vector<1x128xf32>
    %282 = arith.index_cast %c7_i32 : i32 to index
    %c0_67 = arith.constant 0 : index
    %283 = vector.load %arg6[%282, %c0_67] : memref<8x128xf32, #tpu.memory_space<vmem>>, vector<1x128xf32>
    tpu.vector_store %arg6[%282, %c0_67], %281 {strides = array<i32>} : memref<8x128xf32, #tpu.memory_space<vmem>>, vector<1x128xf32>,
    %c8_i32 = arith.constant 8 : i32
    return
  }
  func.func @transform_0(%arg0: i32, %arg1: memref<8xi32, #tpu.memory_space<smem>>) -> (i32, i32) {
    %c0_i32 = arith.constant 0 : i32
    %c0_i32_0 = arith.constant 0 : i32
    %c0_i32_1 = arith.constant 0 : i32
    return %c0_i32, %c0_i32_0 : i32, i32
  }
  func.func @transform_1(%arg0: i32, %arg1: memref<8xi32, #tpu.memory_space<smem>>) -> (i32, i32) {
    %c0_i32 = arith.constant 0 : i32
    %c0_i32_0 = arith.constant 0 : i32
    %c0_i32_1 = arith.constant 0 : i32
    return %c0_i32, %c0_i32_0 : i32, i32
  }
  func.func @transform_2(%arg0: i32, %arg1: memref<8xi32, #tpu.memory_space<smem>>) -> (i32, i32) {
    %c0_i32 = arith.constant 0 : i32
    %c0_i32_0 = arith.constant 0 : i32
    %c0_i32_1 = arith.constant 0 : i32
    return %c0_i32, %c0_i32_0 : i32, i32
  }
  func.func @transform_3(%arg0: i32, %arg1: memref<8xi32, #tpu.memory_space<smem>>) -> (i32, i32) {
    %c0_i32 = arith.constant 0 : i32
    %c0_i32_0 = arith.constant 0 : i32
    %c0_i32_1 = arith.constant 0 : i32
    return %c0_i32, %c0_i32_0 : i32, i32
  }
  func.func @transform_4(%arg0: i32, %arg1: memref<8xi32, #tpu.memory_space<smem>>) -> (i32, i32) {
    %c0_i32 = arith.constant 0 : i32
    %c0_i32_0 = arith.constant 0 : i32
    %c0_i32_1 = arith.constant 0 : i32
    return %c0_i32, %c0_i32_0 : i32, i32
  }
}

</mosaic_0001>

<bundles_post_ra>
// kernel: tpu_custom_call.1
= control target key start
LH: loop header
LB: loop body
LE: loop exit
PB: predicated region body
PF: predicated region fallthrough
CT: control target
= control target key end

     0   :  { %s1095_s18 = smov [#allocation3]   ;;  %s1310_s0 = inlined_call_operand.hbm [shape: s32[8], index: 0, kind: input, shape index: {}]   ;;  %s1311_s1 = inlined_call_operand.hbm [shape: f32[64,128], index: 1, kind: input, shape index: {}]   ;;  %s1312_s2 = inlined_call_operand.hbm [shape: bf16[32,128], index: 2, kind: input, shape index: {}]   ;;  %s1313_s3 = inlined_call_operand.vmem [shape: f32[1,128], index: 3, kind: input, shape index: {}]   ;;  %s1314_s4 = inlined_call_operand.vmem [shape: f32[1,32], index: 4, kind: input, shape index: {}]   ;;  %s1315_s5 = inlined_call_operand.hbm [shape: f32[8,128], index: 5, kind: output, shape index: {}]  }
   0x1   :  { %11 = dma.hbm_to_smem %s1310_s0, 16, %s1095_s18, [#allocation2] }
   0x2   :  { %1087 = dma.done.wait [#allocation2], 16 }
   0x3   :  { %1088 = vsyncadd [#allocation2], 4294967280 }
   0x4   :  { %13 = sfence }
   0x5   :  { %14 = vsyncpa [#allocation5], 0 }
   0x6   :  { %15 = vsyncpa [#allocation8], 0 }
   0x7   :  { %16 = vsyncpa [#allocation6], 0  ;;  %s1096_s21 = smov [#allocation4]  }
   0x8   :  { %s22_s22 = sshll.u32 %s1096_s21, 4  ;;  %s23_s22 = int_to_ptr.vmem [resolvable:$true] %s22_s22 }
   0x9   :  { %s1035_s23 = scalar_lea.vmem %s23_s22, 1024  ;;  %p1040_p1 = scmp.lt.s32.totalorder %s23_s22, %s23_s22 }
   0xa   :  { %p1036_p0 = scmp.ne.s32.totalorder %s23_s22, %s1035_s23  ;;  %p1041_p2 = scmp.lt.s32.totalorder %s1035_s23, %s1035_s23 }
   0xc   :  { %p1042_p3 = por %p1041_p2, %p1040_p1 }
   0xe   :  { %p1043_p4 = pnand %p1042_p3, %p1036_p0 }
  0x10   :  { %1046 = shalt.err (!%p1043_p4)
}
  0x11   :  { %s1097_s24 = smov 128   ;;  %s1098_s25 = smov 8  }
  0x12   :  { %28 = dma.hbm_to_vmem [thread:$0]  %s1311_s1, 1024, %s23_s22, [#allocation5], %s1097_s24, %s1097_s24, %s1098_s25  }
  0x13   :  { %s1099_s27 = smov [#allocation7]  }
  0x14   :  { %s34_s28 = sshll.u32 %s1099_s27, 4  ;;  %s35_s28 = int_to_ptr.vmem [resolvable:$true] %s34_s28 }
  0x15   :  { %s1055_s29 = scalar_lea.vmem %s35_s28, 256  ;;  %p1060_p6 = scmp.lt.s32.totalorder %s35_s28, %s35_s28 }
  0x16   :  { %p1056_p5 = scmp.ne.s32.totalorder %s35_s28, %s1055_s29  ;;  %p1061_p7 = scmp.lt.s32.totalorder %s1055_s29, %s1055_s29 }
  0x18   :  { %p1062_p8 = por %p1061_p7, %p1060_p6 }
  0x1a   :  { %p1063_p9 = pnand %p1062_p8, %p1056_p5 }
  0x1c   :  { %1066 = shalt.err (!%p1063_p9)
}
  0x1d   :  { %s1100_s30 = smov 64   ;;  %s1101_s6 = smov 4  }
  0x1e   :  { %40 = dma.hbm_to_vmem [thread:$0]  %s1312_s2, 256, %s35_s28, [#allocation8], %s1100_s30, %s1100_s30, %s1101_s6  }
  0x1f   :  { %1089 = dma.done.wait [#allocation5], 1024  }
  0x20   :  { %1090 = vsyncadd [#allocation5], 4294966272 }
  0x21   :  { %1091 = dma.done.wait [#allocation8], 256  }
  0x22   :  { %1092 = vsyncadd [#allocation8], 4294967040  ;;  %v1102_v0 = vmov 0.0   ;;  %vm1103_vm0 = vmmov 0   ;;  %v1154_v1 = vld [vmem:[#allocation7 + $0x8] sm:$0xff]   ;;  %v1157_v2 = vld [vmem:[#allocation7] sm:$0xff]   ;;  %v147_v21 = vlaneseq }
  0x23   :  { %893 = vmatprep.subr.bf16.mxu0 %v1102_v0  ;;  %897 = vmatprep.mubr.msk.bf16.mxu0 %vm1103_vm0, %v1102_v0  ;;  %v57_v3 = vld [vmem:[%s1314_s4] sm:$0x1]  ;;  %vm78_vm1 = vcmask 261120   ;;  %s58_s10 = sld [smem:[#allocation3]]  ;;  %s1105_s12 = smov 32  }
  0x24   :  { %901 = vmatprep.subr.bf16.mxu1 %v1102_v0  ;;  %905 = vmatprep.mubr.msk.bf16.mxu1 %vm1103_vm0, %v1102_v0  ;;  %v65_v4 = vpack.c.bf16 %v57_v3, %v57_v3  ;;  %v1179_v5 = vld [vmem:[%s1313_s3] sm:$0x1]  ;;  %v148_v22 = vshrl.u32 %v147_v21, 7  ;;  %s1104_s3 = smov 96   ;;  %s797_s13 = sld [smem:[#allocation3 + $0x1]] }
  0x25   :  { %894 = vmatpush3.bf16.msra.mxu0 %v1154_v1  ;;  %902 = vmatpush3.bf16.msra.mxu1 %v1154_v1  ;;  %s805_s15 = sld [smem:[#allocation3 + $0x2]]  ;;  %s1106_s0 = smov [#allocation9]  }
  0x26   :  { %895 = vmatprep.subr.bf16.mxu0 %v1102_v0  ;;  %903 = vmatprep.subr.bf16.mxu1 %v1102_v0  ;;  %v149_v23 = vsub.s32 0, %v148_v22  ;;  %s813_s17 = sld [smem:[#allocation3 + $0x3]]  ;;  %s770_s27 = sshll.u32 %s1106_s0, 4  ;;  %s771_s27 = int_to_ptr.vmem [resolvable:$true] %s770_s27 }
  0x27   :  { %s821_s19 = sld [smem:[#allocation3 + $0x4]]  ;;  %s1067_s28 = scalar_lea.vmem %s771_s27, 128 }
  0x28   :  { %v150_v25 = vrot.slane %v57_v3, %v149_v23  ;;  %s829_s21 = sld [smem:[#allocation3 + $0x5]] }
  0x29   :  { %896 = vmatpush3.bf16.msra.mxu0 %v1157_v2  ;;  %904 = vmatpush3.bf16.msra.mxu1 %v1157_v2  ;;  %p59_p10 = scmp.gt.s32.totalorder %s58_s10, 0  ;;  %p788_p11 = scmp.lt.s32.totalorder %s58_s10, 63 }
  0x2a   :  { %909 = vmatprep.subr.bf16.mxu0 %v1102_v0  ;;  %917 = vmatprep.subr.bf16.mxu1 %v1102_v0  ;;  %p163_p12 = scmp.gt.s32.totalorder %s797_s13, 0  ;;  %p798_p13 = scmp.lt.s32.totalorder %s797_s13, 63 }
  0x2b   :  { %s1317_s10 = smov (!%p59_p10, %s58_s10), 0  ;;  %p249_p0 = scmp.gt.s32.totalorder %s805_s15, 0 }
  0x2c   :  { %898 = vmatmul.mubr.msk.bf16.vlgmr.msra.gmra.mxu0 %vm78_vm1, %v65_v4  ;;  %s1319_s10 = smov (!%p788_p11, %s1317_s10), 63  ;;  %s1321_s13 = smov (!%p163_p12, %s797_s13), 0 }
  0x2d   :  { %910 = vmatpush3.bf16.msra.mxu0 %v1154_v1  ;;  %913 = vmatprep.mubr.msk.bf16.mxu0 %vm1103_vm0, %v1102_v0  ;;  %s63_s11 = scalar_lea.vmem [#allocation4], %s1319_s10  ;;  %s1323_s13 = smov (!%p798_p13, %s1321_s13), 63 }
  0x2e   :  { %911 = vmatprep.subr.bf16.mxu0 %v1102_v0  ;;  %v64_v11 = vld [vmem:[%s63_s11] sm:$0x1]  ;;  %s167_s14 = scalar_lea.vmem [#allocation4], %s1323_s13  ;;  %p806_p1 = scmp.lt.s32.totalorder %s805_s15, 63 }
  0x2f   :  { %v168_v39 = vld [vmem:[%s167_s14] sm:$0x1]  ;;  %s1325_s15 = smov (!%p249_p0, %s805_s15), 0  ;;  %p335_p2 = scmp.gt.s32.totalorder %s813_s17, 0 }
  0x30   :  { %s1327_s15 = smov (!%p806_p1, %s1325_s15), 63  ;;  %p814_p3 = scmp.lt.s32.totalorder %s813_s17, 63 }
  0x31   :  { %912 = vmatpush3.bf16.msra.mxu0 %v1157_v2  ;;  %s253_s16 = scalar_lea.vmem [#allocation4], %s1327_s15  ;;  %s1329_s17 = smov (!%p335_p2, %s813_s17), 0 }
  0x32   :  { %925 = vmatprep.subr.bf16.mxu0 %v1102_v0  ;;  %v254_v62 = vld [vmem:[%s253_s16] sm:$0x1]  ;;  %s1331_s17 = smov (!%p814_p3, %s1329_s17), 63  ;;  %p421_p4 = scmp.gt.s32.totalorder %s821_s19, 0 }
  0x33   :  { %s339_s18 = scalar_lea.vmem [#allocation4], %s1331_s17  ;;  %p822_p5 = scmp.lt.s32.totalorder %s821_s19, 63 }
  0x34   :  { %s1333_s19 = smov (!%p421_p4, %s821_s19), 0  ;;  %p507_p6 = scmp.gt.s32.totalorder %s829_s21, 0 }
  0x35   :  { %s1335_s19 = smov (!%p822_p5, %s1333_s19), 63  ;;  %p830_p7 = scmp.lt.s32.totalorder %s829_s21, 63 }
  0x36   :  { %s425_s20 = scalar_lea.vmem [#allocation4], %s1335_s19  ;;  %s1337_s21 = smov (!%p507_p6, %s829_s21), 0 }
  0x37   :  { %s1339_s21 = smov (!%p830_p7, %s1337_s21), 63  ;;  %s837_s23 = sld [smem:[#allocation3 + $0x6]] }
  0x38   :  { %s511_s22 = scalar_lea.vmem [#allocation4], %s1339_s21  ;;  %s845_s25 = sld [smem:[#allocation3 + $0x7]] }
  0x39   :  { %p1068_p12 = scmp.ne.s32.totalorder %s771_s27, %s1067_s28  ;;  %p1072_p13 = scmp.lt.s32.totalorder %s771_s27, %s771_s27 }
  0x3a   :  { %p1073_p0 = scmp.lt.s32.totalorder %s1067_s28, %s1067_s28 }
  0x3c   :  { %p1074_p1 = por %p1073_p0, %p1072_p13 }
  0x3d   :  { %p593_p8 = scmp.gt.s32.totalorder %s837_s23, 0  ;;  %p838_p9 = scmp.lt.s32.totalorder %s837_s23, 63 }
  0x3e   :  { %p679_p10 = scmp.gt.s32.totalorder %s845_s25, 0  ;;  %p846_p11 = scmp.lt.s32.totalorder %s845_s25, 63 }
  0x3f   :  { %s1341_s23 = smov (!%p593_p8, %s837_s23), 0  ;;  %p1075_p2 = pnand %p1074_p1, %p1068_p12 }
  0x40   :  { %s1343_s23 = smov (!%p838_p9, %s1341_s23), 63  ;;  %s1345_s25 = smov (!%p679_p10, %s845_s25), 0 }
  0x41   :  { %s597_s24 = scalar_lea.vmem [#allocation4], %s1343_s23  ;;  %s1347_s25 = smov (!%p846_p11, %s1345_s25), 63 }
  0x42   :  { %s683_s26 = scalar_lea.vmem [#allocation4], %s1347_s25 }
  0xec   :  { %v116_v6 = vpop.f32.mrf.mxu0 }
  0xed   :  { %v117_v7 = vadd.f32 %v116_v6, %v1179_v5 }
  0xee   :  { %v899_v8 = vpop.f32.mrf.mxu0 }
  0xef   :  { %130 = vrot.lane.b32.xlu0 %v117_v7, %s1100_s30  ;;  %v122_v12 = vadd.f32 %v117_v7, %v64_v11 }
  0xf0   :  { %v119_v9 = vpop.f32.mrf.mxu0 }
  0xf1   :  { %v796_v13 = vmul.f32 -1.442695, %v122_v12 }
  0xf2   :  { %v900_v10 = vpop.f32.mrf.mxu0 }
  0xf3   :  { %971 = vpow2.f32 %v796_v13 }
 0x100   :  { %v972_v14 = vpop.eup %971 }
 0x101   :  { %v126_v15 = vadd.f32 1.0, %v972_v14 }
 0x103   :  { %973 = vrcp.f32 %v126_v15 }
 0x110   :  { %v974_v16 = vpop.eup %973 }
 0x111   :  { %v140_v27 = vsub.f32 1.0, %v974_v16 }
 0x161   :  { %v131_v17 = vpop.permute.xlu0 %130 }
 0x162   :  { %v133_v18 = vmul.f32 %v974_v16, %v131_v17 }
 0x164   :  { %135 = vrot.lane.b32.xlu0 %v133_v18, %s1100_s30 }
 0x1d6   :  { %v136_v19 = vpop.permute.xlu0 %135 }
 0x1d7   :  { %v138_v20 = vadd.f32 %v136_v19, %v64_v11 }
 0x1d9   :  { %975 = vtanh.f32 %v138_v20 }
 0x1e6   :  { %v976_v24 = vpop.eup %975 }
 0x1e7   :  { %142 = vrot.lane.b32.xlu1 %v976_v24, %s1104_s3 }
 0x1eb   :  { %151 = vrot.lane.b32.xlu1 %v150_v25, %s1105_s12  ;;  %v340_v25 = vld [vmem:[%s339_s18] sm:$0x1] }
 0x259   :  { %v143_v26 = vpop.permute.xlu1 %142 }
 0x25a   :  { %v145_v29 = vmul.f32 %v143_v26, %v140_v27 }
 0x25d   :  { %v152_v28 = vpop.permute.xlu1 %151 }
 0x25e   :  { %v154_v30 = vmul.f32 %v974_v16, %v152_v28 }
 0x260   :  { %v1185_v31 = vadd.f32 %v154_v30, %v145_v29 }
 0x262   :  { %v169_v32 = vpack.c.bf16 %v1185_v31, %v1185_v31 }
 0x264   :  { %171 = vrot.lane.b32.xlu0 %v169_v32, %s1104_s3 }
 0x2d6   :  { %v172_v33 = vpop.permute.xlu0 %171 }
 0x2d7   :  { %906 = vmatmul.mubr.msk.bf16.vlgmr.msra.gmra.mxu1 %vm78_vm1, %v172_v33 }
 0x2d8   :  { %918 = vmatpush3.bf16.msra.mxu1 %v1154_v1  ;;  %921 = vmatprep.mubr.msk.bf16.mxu1 %vm1103_vm0, %v1102_v0 }
 0x2d9   :  { %919 = vmatprep.subr.bf16.mxu1 %v1102_v0 }
 0x2dc   :  { %920 = vmatpush3.bf16.msra.mxu1 %v1157_v2 }
 0x2dd   :  { %933 = vmatprep.subr.bf16.mxu1 %v1102_v0 }
 0x397   :  { %v210_v34 = vpop.f32.mrf.mxu1 }
 0x398   :  { %v211_v35 = vadd.f32 %v210_v34, %v1179_v5 }
 0x399   :  { %v907_v36 = vpop.f32.mrf.mxu1 }
 0x39a   :  { %224 = vrot.lane.b32.xlu1 %v211_v35, %s1100_s30  ;;  %v216_v40 = vadd.f32 %v211_v35, %v168_v39 }
 0x39b   :  { %v213_v37 = vpop.f32.mrf.mxu1 }
 0x39c   :  { %v804_v41 = vmul.f32 -1.442695, %v216_v40 }
 0x39d   :  { %v908_v38 = vpop.f32.mrf.mxu1 }
 0x39e   :  { %977 = vpow2.f32 %v804_v41 }
 0x3ab   :  { %v978_v42 = vpop.eup %977 }
 0x3ac   :  { %v220_v43 = vadd.f32 1.0, %v978_v42 }
 0x3ae   :  { %979 = vrcp.f32 %v220_v43 }
 0x3bb   :  { %v980_v44 = vpop.eup %979 }
 0x3bc   :  { %v234_v50 = vsub.f32 1.0, %v980_v44  ;;  %v240_v52 = vmul.f32 %v980_v44, %v1185_v31 }
 0x40c   :  { %v225_v45 = vpop.permute.xlu1 %224 }
 0x40d   :  { %v227_v46 = vmul.f32 %v980_v44, %v225_v45 }
 0x40f   :  { %229 = vrot.lane.b32.xlu0 %v227_v46, %s1100_s30 }
 0x481   :  { %v230_v47 = vpop.permute.xlu0 %229 }
 0x482   :  { %v232_v48 = vadd.f32 %v230_v47, %v168_v39 }
 0x484   :  { %981 = vtanh.f32 %v232_v48 }
 0x491   :  { %v982_v49 = vpop.eup %981 }
 0x492   :  { %236 = vrot.lane.b32.xlu1 %v982_v49, %s1104_s3  ;;  %v426_v49 = vld [vmem:[%s425_s20] sm:$0x1] }
 0x504   :  { %v237_v51 = vpop.permute.xlu1 %236 }
 0x505   :  { %v239_v53 = vmul.f32 %v237_v51, %v234_v50 }
 0x507   :  { %v1202_v54 = vadd.f32 %v240_v52, %v239_v53 }
 0x509   :  { %v255_v55 = vpack.c.bf16 %v1202_v54, %v1202_v54 }
 0x50b   :  { %257 = vrot.lane.b32.xlu0 %v255_v55, %s1104_s3 }
 0x57d   :  { %v258_v56 = vpop.permute.xlu0 %257 }
 0x57e   :  { %914 = vmatmul.mubr.msk.bf16.vlgmr.msra.gmra.mxu0 %vm78_vm1, %v258_v56 }
 0x57f   :  { %926 = vmatpush3.bf16.msra.mxu0 %v1154_v1  ;;  %929 = vmatprep.mubr.msk.bf16.mxu0 %vm1103_vm0, %v1102_v0 }
 0x580   :  { %927 = vmatprep.subr.bf16.mxu0 %v1102_v0 }
 0x583   :  { %928 = vmatpush3.bf16.msra.mxu0 %v1157_v2 }
 0x584   :  { %941 = vmatprep.subr.bf16.mxu0 %v1102_v0 }
 0x63e   :  { %v296_v57 = vpop.f32.mrf.mxu0 }
 0x63f   :  { %v297_v58 = vadd.f32 %v296_v57, %v1179_v5 }
 0x640   :  { %v915_v59 = vpop.f32.mrf.mxu0 }
 0x641   :  { %310 = vrot.lane.b32.xlu1 %v297_v58, %s1100_s30  ;;  %v302_v63 = vadd.f32 %v297_v58, %v254_v62 }
 0x642   :  { %v299_v60 = vpop.f32.mrf.mxu0 }
 0x643   :  { %v812_v3 = vmul.f32 -1.442695, %v302_v63 }
 0x644   :  { %v916_v61 = vpop.f32.mrf.mxu0 }
 0x645   :  { %983 = vpow2.f32 %v812_v3 }
 0x652   :  { %v984_v4 = vpop.eup %983 }
 0x653   :  { %v306_v6 = vadd.f32 1.0, %v984_v4 }
 0x655   :  { %985 = vrcp.f32 %v306_v6 }
 0x662   :  { %v986_v7 = vpop.eup %985 }
 0x663   :  { %v320_v13 = vsub.f32 1.0, %v986_v7  ;;  %v326_v15 = vmul.f32 %v986_v7, %v1202_v54 }
 0x6b3   :  { %v311_v8 = vpop.permute.xlu1 %310 }
 0x6b4   :  { %v313_v9 = vmul.f32 %v986_v7, %v311_v8 }
 0x6b6   :  { %315 = vrot.lane.b32.xlu0 %v313_v9, %s1100_s30 }
 0x728   :  { %v316_v10 = vpop.permute.xlu0 %315 }
 0x729   :  { %v318_v11 = vadd.f32 %v316_v10, %v254_v62 }
 0x72b   :  { %987 = vtanh.f32 %v318_v11 }
 0x738   :  { %v988_v12 = vpop.eup %987 }
 0x739   :  { %322 = vrot.lane.b32.xlu1 %v988_v12, %s1104_s3 }
 0x7ab   :  { %v323_v14 = vpop.permute.xlu1 %322 }
 0x7ac   :  { %v325_v16 = vmul.f32 %v323_v14, %v320_v13 }
 0x7ae   :  { %v1219_v17 = vadd.f32 %v326_v15, %v325_v16 }
 0x7b0   :  { %v341_v18 = vpack.c.bf16 %v1219_v17, %v1219_v17 }
 0x7b2   :  { %343 = vrot.lane.b32.xlu0 %v341_v18, %s1104_s3 }
 0x824   :  { %v344_v19 = vpop.permute.xlu0 %343 }
 0x825   :  { %922 = vmatmul.mubr.msk.bf16.vlgmr.msra.gmra.mxu1 %vm78_vm1, %v344_v19 }
 0x826   :  { %934 = vmatpush3.bf16.msra.mxu1 %v1154_v1  ;;  %937 = vmatprep.mubr.msk.bf16.mxu1 %vm1103_vm0, %v1102_v0 }
 0x827   :  { %935 = vmatprep.subr.bf16.mxu1 %v1102_v0 }
 0x82a   :  { %936 = vmatpush3.bf16.msra.mxu1 %v1157_v2 }
 0x82b   :  { %949 = vmatprep.subr.bf16.mxu1 %v1102_v0 }
 0x8e5   :  { %v382_v20 = vpop.f32.mrf.mxu1 }
 0x8e6   :  { %v383_v21 = vadd.f32 %v382_v20, %v1179_v5 }
 0x8e7   :  { %v923_v22 = vpop.f32.mrf.mxu1 }
 0x8e8   :  { %396 = vrot.lane.b32.xlu1 %v383_v21, %s1100_s30  ;;  %v388_v26 = vadd.f32 %v383_v21, %v340_v25 }
 0x8e9   :  { %v385_v23 = vpop.f32.mrf.mxu1 }
 0x8ea   :  { %v820_v27 = vmul.f32 -1.442695, %v388_v26 }
 0x8eb   :  { %v924_v24 = vpop.f32.mrf.mxu1 }
 0x8ec   :  { %989 = vpow2.f32 %v820_v27 }
 0x8f9   :  { %v990_v28 = vpop.eup %989 }
 0x8fa   :  { %v392_v29 = vadd.f32 1.0, %v990_v28 }
 0x8fc   :  { %991 = vrcp.f32 %v392_v29 }
 0x909   :  { %v992_v30 = vpop.eup %991 }
 0x90a   :  { %v406_v37 = vsub.f32 1.0, %v992_v30  ;;  %v412_v39 = vmul.f32 %v992_v30, %v1219_v17 }
 0x95a   :  { %v397_v32 = vpop.permute.xlu1 %396 }
 0x95b   :  { %v399_v33 = vmul.f32 %v992_v30, %v397_v32 }
 0x95d   :  { %401 = vrot.lane.b32.xlu0 %v399_v33, %s1100_s30 }
 0x9cf   :  { %v402_v34 = vpop.permute.xlu0 %401 }
 0x9d0   :  { %v404_v35 = vadd.f32 %v402_v34, %v340_v25 }
 0x9d2   :  { %993 = vtanh.f32 %v404_v35  ;;  %v598_v35 = vld [vmem:[%s597_s24] sm:$0x1] }
 0x9df   :  { %v994_v36 = vpop.eup %993 }
 0x9e0   :  { %408 = vrot.lane.b32.xlu1 %v994_v36, %s1104_s3 }
 0xa52   :  { %v409_v38 = vpop.permute.xlu1 %408 }
 0xa53   :  { %v411_v40 = vmul.f32 %v409_v38, %v406_v37 }
 0xa55   :  { %v1236_v41 = vadd.f32 %v412_v39, %v411_v40 }
 0xa57   :  { %v427_v42 = vpack.c.bf16 %v1236_v41, %v1236_v41 }
 0xa59   :  { %429 = vrot.lane.b32.xlu0 %v427_v42, %s1104_s3 }
 0xacb   :  { %v430_v43 = vpop.permute.xlu0 %429 }
 0xacc   :  { %930 = vmatmul.mubr.msk.bf16.vlgmr.msra.gmra.mxu0 %vm78_vm1, %v430_v43 }
 0xacd   :  { %942 = vmatpush3.bf16.msra.mxu0 %v1154_v1  ;;  %945 = vmatprep.mubr.msk.bf16.mxu0 %vm1103_vm0, %v1102_v0 }
 0xace   :  { %943 = vmatprep.subr.bf16.mxu0 %v1102_v0 }
 0xad1   :  { %944 = vmatpush3.bf16.msra.mxu0 %v1157_v2 }
 0xb8c   :  { %v468_v44 = vpop.f32.mrf.mxu0 }
 0xb8d   :  { %v469_v45 = vadd.f32 %v468_v44, %v1179_v5 }
 0xb8e   :  { %v931_v46 = vpop.f32.mrf.mxu0 }
 0xb8f   :  { %482 = vrot.lane.b32.xlu1 %v469_v45, %s1100_s30  ;;  %v474_v50 = vadd.f32 %v469_v45, %v426_v49 }
 0xb90   :  { %v471_v47 = vpop.f32.mrf.mxu0 }
 0xb91   :  { %v828_v51 = vmul.f32 -1.442695, %v474_v50 }
 0xb92   :  { %v932_v48 = vpop.f32.mrf.mxu0 }
 0xb93   :  { %995 = vpow2.f32 %v828_v51 }
 0xba0   :  { %v996_v52 = vpop.eup %995 }
 0xba1   :  { %v478_v53 = vadd.f32 1.0, %v996_v52 }
 0xba3   :  { %997 = vrcp.f32 %v478_v53 }
 0xbb0   :  { %v998_v55 = vpop.eup %997 }
 0xbb1   :  { %v492_v61 = vsub.f32 1.0, %v998_v55  ;;  %v498_v63 = vmul.f32 %v998_v55, %v1236_v41 }
 0xc01   :  { %v483_v56 = vpop.permute.xlu1 %482 }
 0xc02   :  { %v485_v57 = vmul.f32 %v998_v55, %v483_v56 }
 0xc04   :  { %487 = vrot.lane.b32.xlu0 %v485_v57, %s1100_s30 }
 0xc76   :  { %v488_v58 = vpop.permute.xlu0 %487 }
 0xc77   :  { %v490_v59 = vadd.f32 %v488_v58, %v426_v49 }
 0xc79   :  { %999 = vtanh.f32 %v490_v59 }
 0xc86   :  { %v1000_v60 = vpop.eup %999 }
 0xc87   :  { %494 = vrot.lane.b32.xlu1 %v1000_v60, %s1104_s3  ;;  %v684_v60 = vld [vmem:[%s683_s26] sm:$0x1] }
 0xcf9   :  { %v495_v62 = vpop.permute.xlu1 %494 }
 0xcfa   :  { %v497_v3 = vmul.f32 %v495_v62, %v492_v61 }
 0xcfc   :  { %v1252_v4 = vadd.f32 %v498_v63, %v497_v3 }
 0xcfe   :  { %v513_v6 = vpack.c.bf16 %v1252_v4, %v1252_v4 }
 0xd00   :  { %515 = vrot.lane.b32.xlu0 %v513_v6, %s1104_s3 }
 0xd72   :  { %v516_v7 = vpop.permute.xlu0 %515 }
 0xd73   :  { %938 = vmatmul.mubr.msk.bf16.vlgmr.msra.gmra.mxu1 %vm78_vm1, %v516_v7 }
 0xd74   :  { %950 = vmatpush3.bf16.msra.mxu1 %v1154_v1  ;;  %953 = vmatprep.mubr.msk.bf16.mxu1 %vm1103_vm0, %v1102_v0  ;;  %v512_v1 = vld [vmem:[%s511_s22] sm:$0x1] }
 0xd75   :  { %951 = vmatprep.subr.bf16.mxu1 %v1102_v0 }
 0xd78   :  { %952 = vmatpush3.bf16.msra.mxu1 %v1157_v2 }
 0xe33   :  { %v554_v8 = vpop.f32.mrf.mxu1 }
 0xe34   :  { %v555_v9 = vadd.f32 %v554_v8, %v1179_v5 }
 0xe35   :  { %v939_v10 = vpop.f32.mrf.mxu1 }
 0xe36   :  { %568 = vrot.lane.b32.xlu1 %v555_v9, %s1100_s30  ;;  %v560_v13 = vadd.f32 %v555_v9, %v512_v1 }
 0xe37   :  { %v557_v11 = vpop.f32.mrf.mxu1 }
 0xe38   :  { %v836_v14 = vmul.f32 -1.442695, %v560_v13 }
 0xe39   :  { %v940_v12 = vpop.f32.mrf.mxu1 }
 0xe3a   :  { %1001 = vpow2.f32 %v836_v14 }
 0xe47   :  { %v1002_v0 = vpop.eup %1001 }
 0xe48   :  { %v564_v2 = vadd.f32 1.0, %v1002_v0 }
 0xe4a   :  { %1003 = vrcp.f32 %v564_v2 }
 0xe57   :  { %v1004_v15 = vpop.eup %1003 }
 0xe58   :  { %v578_v22 = vsub.f32 1.0, %v1004_v15  ;;  %v584_v24 = vmul.f32 %v1004_v15, %v1252_v4 }
 0xea8   :  { %v569_v16 = vpop.permute.xlu1 %568 }
 0xea9   :  { %v571_v18 = vmul.f32 %v1004_v15, %v569_v16 }
 0xeab   :  { %573 = vrot.lane.b32.xlu0 %v571_v18, %s1100_s30 }
 0xf1d   :  { %v574_v19 = vpop.permute.xlu0 %573 }
 0xf1e   :  { %v576_v20 = vadd.f32 %v574_v19, %v512_v1 }
 0xf20   :  { %1005 = vtanh.f32 %v576_v20 }
 0xf2d   :  { %v1006_v21 = vpop.eup %1005 }
 0xf2e   :  { %580 = vrot.lane.b32.xlu1 %v1006_v21, %s1104_s3 }
 0xfa0   :  { %v581_v23 = vpop.permute.xlu1 %580 }
 0xfa1   :  { %v583_v25 = vmul.f32 %v581_v23, %v578_v22 }
 0xfa3   :  { %v1268_v26 = vadd.f32 %v584_v24, %v583_v25 }
 0xfa5   :  { %v599_v27 = vpack.c.bf16 %v1268_v26, %v1268_v26 }
 0xfa7   :  { %601 = vrot.lane.b32.xlu0 %v599_v27, %s1104_s3 }
0x1019   :  { %v602_v28 = vpop.permute.xlu0 %601 }
0x101a   :  { %946 = vmatmul.mubr.msk.bf16.vlgmr.msra.gmra.mxu0 %vm78_vm1, %v602_v28 }
0x10da   :  { %v640_v29 = vpop.f32.mrf.mxu0 }
0x10db   :  { %v641_v30 = vadd.f32 %v640_v29, %v1179_v5 }
0x10dc   :  { %v947_v32 = vpop.f32.mrf.mxu0 }
0x10dd   :  { %654 = vrot.lane.b32.xlu1 %v641_v30, %s1100_s30  ;;  %v646_v36 = vadd.f32 %v641_v30, %v598_v35 }
0x10de   :  { %v643_v33 = vpop.f32.mrf.mxu0 }
0x10df   :  { %v844_v37 = vmul.f32 -1.442695, %v646_v36 }
0x10e0   :  { %v948_v34 = vpop.f32.mrf.mxu0 }
0x10e1   :  { %1007 = vpow2.f32 %v844_v37 }
0x10ee   :  { %v1008_v38 = vpop.eup %1007 }
0x10ef   :  { %v650_v39 = vadd.f32 1.0, %v1008_v38 }
0x10f1   :  { %1009 = vrcp.f32 %v650_v39 }
0x10fe   :  { %v1010_v40 = vpop.eup %1009 }
0x10ff   :  { %v664_v47 = vsub.f32 1.0, %v1010_v40  ;;  %v670_v49 = vmul.f32 %v1010_v40, %v1268_v26 }
0x114f   :  { %v655_v42 = vpop.permute.xlu1 %654 }
0x1150   :  { %v657_v43 = vmul.f32 %v1010_v40, %v655_v42 }
0x1152   :  { %659 = vrot.lane.b32.xlu0 %v657_v43, %s1100_s30 }
0x11c4   :  { %v660_v44 = vpop.permute.xlu0 %659 }
0x11c5   :  { %v662_v45 = vadd.f32 %v660_v44, %v598_v35 }
0x11c7   :  { %1011 = vtanh.f32 %v662_v45 }
0x11d4   :  { %v1012_v46 = vpop.eup %1011 }
0x11d5   :  { %666 = vrot.lane.b32.xlu1 %v1012_v46, %s1104_s3 }
0x1247   :  { %v667_v48 = vpop.permute.xlu1 %666 }
0x1248   :  { %v669_v50 = vmul.f32 %v667_v48, %v664_v47 }
0x124a   :  { %v671_v51 = vadd.f32 %v670_v49, %v669_v50 }
0x124c   :  { %v685_v52 = vpack.c.bf16 %v671_v51, %v671_v51 }
0x124e   :  { %687 = vrot.lane.b32.xlu0 %v685_v52, %s1104_s3 }
0x12c0   :  { %v688_v53 = vpop.permute.xlu0 %687 }
0x12c1   :  { %954 = vmatmul.mubr.msk.bf16.vlgmr.msra.gmra.mxu1 %vm78_vm1, %v688_v53 }
0x1381   :  { %v726_v55 = vpop.f32.mrf.mxu1 }
0x1382   :  { %v727_v56 = vadd.f32 %v726_v55, %v1179_v5 }
0x1383   :  { %v955_v57 = vpop.f32.mrf.mxu1 }
0x1384   :  { %740 = vrot.lane.b32.xlu1 %v727_v56, %s1100_s30  ;;  %v732_v61 = vadd.f32 %v727_v56, %v684_v60 }
0x1385   :  { %v729_v58 = vpop.f32.mrf.mxu1 }
0x1386   :  { %v852_v62 = vmul.f32 -1.442695, %v732_v61 }
0x1387   :  { %v956_v59 = vpop.f32.mrf.mxu1 }
0x1388   :  { %1013 = vpow2.f32 %v852_v62 }
0x1395   :  { %v1014_v63 = vpop.eup %1013 }
0x1396   :  { %v736_v3 = vadd.f32 1.0, %v1014_v63 }
0x1398   :  { %1015 = vrcp.f32 %v736_v3 }
0x13a5   :  { %v1016_v6 = vpop.eup %1015 }
0x13a6   :  { %v750_v0 = vsub.f32 1.0, %v1016_v6  ;;  %v756_v15 = vmul.f32 %v1016_v6, %v671_v51 }
0x13f6   :  { %v741_v5 = vpop.permute.xlu1 %740 }
0x13f7   :  { %v743_v7 = vmul.f32 %v1016_v6, %v741_v5 }
0x13f9   :  { %745 = vrot.lane.b32.xlu0 %v743_v7, %s1100_s30 }
0x13fd   :  { %157 = vrot.lane.b32.xlu0 %v1185_v31, %s1104_s3 }
0x1401   :  { %329 = vrot.lane.b32.xlu0 %v1219_v17, %s1104_s3 }
0x1405   :  { %501 = vrot.lane.b32.xlu0 %v1252_v4, %s1104_s3 }
0x1409   :  { %673 = vrot.lane.b32.xlu0 %v671_v51, %s1104_s3 }
0x146b   :  { %v746_v8 = vpop.permute.xlu0 %745 }
0x146c   :  { %v748_v9 = vadd.f32 %v746_v8, %v684_v60 }
0x146e   :  { %1017 = vtanh.f32 %v748_v9 }
0x146f   :  { %v158_v10 = vpop.permute.xlu0 %157 }
0x1470   :  { %v160_v11 = vsel %vm78_vm1, %v158_v10, 0.0 }
0x1471   :  { %161 = vst [vmem:[#allocation9] sm:$0x1] %v160_v11 }
0x1473   :  { %v330_v12 = vpop.permute.xlu0 %329 }
0x1474   :  { %v332_v1 = vsel %vm78_vm1, %v330_v12, 0.0 }
0x1475   :  { %333 = vst [vmem:[#allocation9 + $0x2] sm:$0x1] %v332_v1 }
0x1477   :  { %v502_v31 = vpop.permute.xlu0 %501 }
0x1478   :  { %v504_v13 = vsel %vm78_vm1, %v502_v31, 0.0 }
0x1479   :  { %505 = vst [vmem:[#allocation9 + $0x4] sm:$0x1] %v504_v13 }
0x147b   :  { %v1018_v17 = vpop.eup %1017  ;;  %v674_v14 = vpop.permute.xlu0 %673 }
0x147c   :  { %v676_v4 = vsel %vm78_vm1, %v674_v14, 0.0  ;;  %752 = vrot.lane.b32.xlu1 %v1018_v17, %s1104_s3 }
0x147d   :  { %677 = vst [vmem:[#allocation9 + $0x6] sm:$0x1] %v676_v4 }
0x1480   :  { %243 = vrot.lane.b32.xlu1 %v1202_v54, %s1104_s3 }
0x1484   :  { %415 = vrot.lane.b32.xlu1 %v1236_v41, %s1104_s3 }
0x1488   :  { %587 = vrot.lane.b32.xlu1 %v1268_v26, %s1104_s3 }
0x14ee   :  { %v753_v2 = vpop.permute.xlu1 %752 }
0x14ef   :  { %v755_v16 = vmul.f32 %v753_v2, %v750_v0 }
0x14f1   :  { %v757_v18 = vadd.f32 %v756_v15, %v755_v16 }
0x14f2   :  { %v244_v19 = vpop.permute.xlu1 %243 }
0x14f3   :  { %v246_v20 = vsel %vm78_vm1, %v244_v19, 0.0  ;;  %759 = vrot.lane.b32.xlu1 %v757_v18, %s1104_s3 }
0x14f4   :  { %247 = vst [vmem:[#allocation9 + $0x1] sm:$0x1] %v246_v20 }
0x14f6   :  { %v416_v21 = vpop.permute.xlu1 %415 }
0x14f7   :  { %v418_v54 = vsel %vm78_vm1, %v416_v21, 0.0 }
0x14f8   :  { %419 = vst [vmem:[#allocation9 + $0x3] sm:$0x1] %v418_v54 }
0x14fa   :  { %v588_v22 = vpop.permute.xlu1 %587 }
0x14fb   :  { %v590_v41 = vsel %vm78_vm1, %v588_v22, 0.0 }
0x14fc   :  { %591 = vst [vmem:[#allocation9 + $0x5] sm:$0x1] %v590_v41 }
0x1565   :  { %v760_v23 = vpop.permute.xlu1 %759 }
0x1566   :  { %v762_v24 = vsel %vm78_vm1, %v760_v23, 0.0 }
0x1567   :  { %763 = vst [vmem:[#allocation9 + $0x7] sm:$0x1] %v762_v24 }
0x1568   :  { %1078 = shalt.err (!%p1075_p2)
}
0x1569   :  { %773 = dma.vmem_to_hbm [thread:$0]  %s771_s27, 128, %s1315_s5, [#allocation6]  }
0x156a   :  { %1093 = dma.done.wait [#allocation6], 128  }
0x156b   :  { %1094 = vsyncadd [#allocation6], 4294967168 }
0x156c   :  { %777 = vsyncpa [#allocation5], 1 }
0x156d   :  { %778 = vsyncpa [#allocation8], 1 }
0x156e   :  { %779 = vsyncpa [#allocation6], 1 }

</bundles_post_ra>
